<compile_context>
chip_gen: v7x
topology: tpu7x:2x2x1
jax: 0.10.0
libtpu: 0.0.40
codegen_flags: <defaults>
</compile_context>

<pallas_src>
import functools

import jax
import jax.numpy as jnp
from jax.experimental import pallas as pl
from jax.experimental.pallas import tpu as pltpu

_NEG_BIG = -1e30  # poison value baked into padded bias columns


def _generator_kernel(x_ref, w_ref, b_ref, o_ref, m_ref, l_ref, *, tv):
    # x_ref : (TM, d_model)   bf16, VMEM-resident across the whole vocab sweep
    # w_ref : (d_model, TV)   bf16, streamed per vocab tile
    # b_ref : (1, TV)         f32,  streamed (padded cols pre-poisoned to -1e30)
    # o_ref : (TM, vocab_pad) row-resident logits slab (accumulator)
    # m_ref / l_ref : (TM, 1) f32 running max / running sum(exp)
    j = pl.program_id(1)
    nj = pl.num_programs(1)

    @pl.when(j == 0)
    def _():
        m_ref[...] = jnp.full_like(m_ref, -jnp.inf)
        l_ref[...] = jnp.zeros_like(l_ref)

    # bf16 MXU matmul with f32 accumulation; bias added in f32. No casts here:
    # operands are already bf16 at rest.
    logits = jnp.dot(x_ref[...], w_ref[...],
                     preferred_element_type=jnp.float32) + b_ref[...]

    # Online logsumexp across the vocab sweep (EUP exp, XLU reductions).
    # Padded vocab columns carry logit == -1e30 (zero weight + poisoned bias),
    # so they never win the max and exp() underflows to 0 — no masking needed.
    m_prev = m_ref[...]
    m_new = jnp.maximum(m_prev, jnp.max(logits, axis=-1, keepdims=True))
    l_ref[...] = (l_ref[...] * jnp.exp(m_prev - m_new)
                  + jnp.sum(jnp.exp(logits - m_new), axis=-1, keepdims=True))
    m_ref[...] = m_new

    # Stash raw logits into the row-resident, lane-dense output slab.
    off = pl.multiple_of(j * tv, tv)
    o_ref[:, pl.ds(off, tv)] = logits.astype(o_ref.dtype)

    # Finalize log_softmax once the whole vocab has been visited.
    # TODO(synk): for very large vocabularies (e.g. 128K on v7x) it is cheaper
    # to emit lse as a separate (N, 1) output with per-tile (TM, TV) output
    # blocks and let the consumer apply it, instead of holding / re-reading
    # the full-width slab here.
    @pl.when(j == nj - 1)
    def _():
        lse = m_ref[...] + jnp.log(l_ref[...])
        o_ref[...] = (o_ref[...].astype(jnp.float32) - lse).astype(o_ref.dtype)


def _vmem_capacity_bytes():
    try:
        return int(pltpu.get_tpu_info().vmem_capacity_bytes)
    except Exception:
        return 64 << 20  # conservative fallback (v7x per-TC VMEM)


def prepare_generator_params(weight, bias, *, vocab_tile=512,
                             param_dtype=jnp.bfloat16):
    """One-time parameter prep (do NOT call per forward step).

    Pads vocab up to the tile grid (zero weight columns, -1e30 bias columns so
    the kernel needs no masking) and pre-casts the weight to bf16 so the
    streamed weight DMA is half-width and the kernel has no per-tile casts.
    """
    d_model, vocab = weight.shape
    if vocab > vocab_tile:
        vocab_pad = pl.cdiv(vocab, vocab_tile) * vocab_tile
    else:
        vocab_pad = pl.cdiv(vocab, 128) * 128  # lane-dense minimum
    pad = vocab_pad - vocab
    weight_p = jnp.pad(weight, ((0, 0), (0, pad))).astype(param_dtype)
    bias_p = jnp.pad(bias.astype(jnp.float32), (0, pad),
                     constant_values=_NEG_BIG).reshape(1, vocab_pad)
    return weight_p, bias_p


@functools.partial(
    jax.jit, static_argnames=("vocab", "row_tile", "vocab_tile", "out_dtype"))
def generator_forward(x, weight_p, bias_p, *, vocab, row_tile=512,
                      vocab_tile=512, out_dtype=jnp.float32):
    """x: (B, S, d_model); weight_p/bias_p from prepare_generator_params."""
    B, S, d_model = x.shape
    vocab_pad = weight_p.shape[1]
    N = B * S

    # ---- vocab tile: lane-dense, must divide the padded vocab --------------
    tv = min(vocab_tile, vocab_pad)
    if vocab_pad % tv != 0:
        tv = vocab_pad  # fallback: single vocab tile
    num_j = vocab_pad // tv

    # ---- row tile: as large as the per-generation VMEM budget allows -------
    out_isz = jnp.dtype(out_dtype).itemsize
    w_isz = jnp.dtype(weight_p.dtype).itemsize
    cap = _vmem_capacity_bytes()
    budget = int(cap * 0.8)
    # double-buffered streamed weight + bias tiles (bias sublane-pads 1 -> 8)
    fixed = 2 * d_model * tv * w_isz + 2 * 8 * tv * 4
    per_row = (2 * vocab_pad * out_isz      # double-buffered output slab
               + 2 * d_model * w_isz        # double-buffered bf16 x tile
               + 2 * 4)                     # (TM,1) m / l f32 scratch
    tm_fit = max(8, ((budget - fixed) // per_row) // 8 * 8)
    tm = min(row_tile, N, tm_fit)
    if tm >= N:
        tm = N                              # full extent
    else:
        tm = max(8, tm // 8 * 8)            # keep sublane-aligned
    num_i = pl.cdiv(N, tm)

    # bf16 activations: halves x DMA and matches the pre-cast bf16 weights.
    x2d = x.reshape(N, d_model).astype(weight_p.dtype)

    est = fixed + tm * per_row
    vmem_limit = max(int(est * 1.3) + (4 << 20), 32 << 20)
    vmem_limit = int(min(vmem_limit, cap * 9 // 10))

    kernel = functools.partial(_generator_kernel, tv=tv)

    out = pl.pallas_call(
        kernel,
        out_shape=jax.ShapeDtypeStruct((N, vocab_pad), out_dtype),
        grid_spec=pltpu.PrefetchScalarGridSpec(
            num_scalar_prefetch=0,
            grid=(num_i, num_j),            # vocab (accumulator) axis innermost
            in_specs=[
                # activation tile: VMEM-resident across the whole vocab sweep
                pl.BlockSpec((tm, d_model), lambda i, j: (i, 0)),
                # streamed weight / bias tiles
                pl.BlockSpec((d_model, tv), lambda i, j: (0, j)),
                pl.BlockSpec((1, tv), lambda i, j: (0, j)),
            ],
            # row-resident, lane-dense logits slab (acts as the accumulator)
            out_specs=pl.BlockSpec((tm, vocab_pad), lambda i, j: (i, 0)),
            scratch_shapes=[
                pltpu.VMEM((tm, 1), jnp.float32),   # running max
                pltpu.VMEM((tm, 1), jnp.float32),   # running sum(exp)
            ],
        ),
        compiler_params=pltpu.CompilerParams(
            dimension_semantics=("parallel", "arbitrary"),
            vmem_limit_bytes=vmem_limit,
        ),
    )(x2d, weight_p, bias_p)

    if vocab_pad != vocab:
        out = out[:, :vocab]
    return out.reshape(B, S, vocab)


def init_generator_params(key, d_model, vocab):
    # Deterministic init mimicking nn.Linear default (uniform +/- 1/sqrt(d_model)).
    kw, kb = jax.random.split(key)
    bound = 1.0 / jnp.sqrt(jnp.float32(d_model))
    weight = jax.random.uniform(
        kw, (d_model, vocab), jnp.float32, minval=-bound, maxval=bound)
    bias = jax.random.uniform(
        kb, (vocab,), jnp.float32, minval=-bound, maxval=bound)
    return weight, bias


def _check(out, x, weight, bias, *, atol):
    ref = jax.nn.log_softmax(x @ weight + bias, axis=-1)
    probs_sum = jnp.sum(jnp.exp(out), axis=-1)
    assert jnp.allclose(probs_sum, 1.0, atol=1e-3), "rows do not normalize"
    # bf16 matmul inside the kernel vs f32 reference -> relaxed tolerance
    assert jnp.max(jnp.abs(out - ref)) < atol, float(jnp.max(jnp.abs(out - ref)))


if __name__ == "__main__":
    key = jax.random.PRNGKey(0)
    k_x, k_p, k_p2 = jax.random.split(key, 3)

    batch, seq, d_model, vocab = 2, 8, 32, 512
    x = jax.random.normal(k_x, (batch, seq, d_model), jnp.float32)
    weight, bias = init_generator_params(k_p, d_model, vocab)

    # 1) default tiling (single vocab tile at this toy size)
    w_p, b_p = prepare_generator_params(weight, bias)
    out = generator_forward(x, w_p, b_p, vocab=vocab)
    jax.block_until_ready(out)
    assert out.shape == (batch, seq, vocab)
    _check(out, x, weight, bias, atol=5e-2)

    # 2) force the streaming-vocab / online-softmax path (4 vocab tiles,
    #    2 row tiles) and check it matches
    out_t = generator_forward(x, w_p, b_p, vocab=vocab,
                              row_tile=8, vocab_tile=128)
    jax.block_until_ready(out_t)
    _check(out_t, x, weight, bias, atol=5e-2)

    # 3) vocab not a multiple of the vocab tile -> exercises the padded /
    #    poisoned-bias path (no in-kernel masking)
    vocab3 = 200
    weight3, bias3 = init_generator_params(k_p2, d_model, vocab3)
    w3_p, b3_p = prepare_generator_params(weight3, bias3, vocab_tile=128)
    out3 = generator_forward(x, w3_p, b3_p, vocab=vocab3, vocab_tile=128)
    jax.block_until_ready(out3)
    assert out3.shape == (batch, seq, vocab3)
    _check(out3, x, weight3, bias3, atol=5e-2)

    print("KERNEL_OK")
</pallas_src>

<mosaic_0001>
module attributes {stable_mosaic.version = 11 : i64} {
  func.func @_generator_kernel(%arg0: i32, %arg1: i32, %arg2: memref<16x32xbf16, #tpu.memory_space<vmem>>, %arg3: memref<32x512xbf16, #tpu.memory_space<vmem>>, %arg4: memref<1x512xf32, #tpu.memory_space<vmem>>, %arg5: memref<16x512xf32, #tpu.memory_space<vmem>>, %arg6: memref<16x1xf32, #tpu.memory_space<vmem>>, %arg7: memref<16x1xf32, #tpu.memory_space<vmem>>) attributes {dimension_semantics = [#tpu.dimension_semantics<parallel>, #tpu.dimension_semantics<arbitrary>], iteration_bounds = array<i64: 1, 1>, scalar_prefetch = 0 : i64, scratch_operands = 2 : i64, tpu.core_type = #tpu.core_type<tc>, window_params = [{transform_indices = @transform_0, window_bounds = array<i64: 16, 32>}, {transform_indices = @transform_1, window_bounds = array<i64: 32, 512>}, {transform_indices = @transform_2, window_bounds = array<i64: 1, 512>}, {transform_indices = @transform_3, window_bounds = array<i64: 16, 512>}]} {
    %c0_i32 = arith.constant 0 : i32
    %0 = arith.cmpi eq, %arg1, %c0_i32 : i32
    %1 = arith.extui %0 : i1 to i32
    %c0_i32_0 = arith.constant 0 : i32
    %2 = arith.cmpi ne, %1, %c0_i32_0 : i32
    scf.if %2 {
      %cst_19 = arith.constant 0xFF800000 : f32
      %32 = vector.broadcast %cst_19 : f32 to vector<16x1xf32>
      %c0_20 = arith.constant 0 : index
      %c0_21 = arith.constant 0 : index
      %33 = vector.load %arg6[%c0_20, %c0_21] : memref<16x1xf32, #tpu.memory_space<vmem>>, vector<16x1xf32>
      tpu.vector_store %arg6[%c0_20, %c0_21], %32 {strides = array<i32>} : memref<16x1xf32, #tpu.memory_space<vmem>>, vector<16x1xf32>,
      %cst_22 = arith.constant 0.000000e+00 : f32
      %34 = vector.broadcast %cst_22 : f32 to vector<16x1xf32>
      %c0_23 = arith.constant 0 : index
      %c0_24 = arith.constant 0 : index
      %35 = vector.load %arg7[%c0_23, %c0_24] : memref<16x1xf32, #tpu.memory_space<vmem>>, vector<16x1xf32>
      tpu.vector_store %arg7[%c0_23, %c0_24], %34 {strides = array<i32>} : memref<16x1xf32, #tpu.memory_space<vmem>>, vector<16x1xf32>,
    } else {
    }
    %c0 = arith.constant 0 : index
    %c0_1 = arith.constant 0 : index
    %3 = vector.load %arg2[%c0, %c0_1] : memref<16x32xbf16, #tpu.memory_space<vmem>>, vector<16x32xbf16>
    %c0_2 = arith.constant 0 : index
    %c0_3 = arith.constant 0 : index
    %4 = vector.load %arg3[%c0_2, %c0_3] : memref<32x512xbf16, #tpu.memory_space<vmem>>, vector<32x512xbf16>
    %cst = arith.constant dense<0.000000e+00> : vector<16x512xf32>
    %5 = tpu.matmul %3, %4, %cst {dimension_numbers = #tpu.dot_dimension_numbers<[1], [0], [0], [1], [0, 0, 1, 1], [], []>} : vector<16x32xbf16>, vector<32x512xbf16>, vector<16x512xf32> -> vector<16x512xf32>
    %c0_4 = arith.constant 0 : index
    %c0_5 = arith.constant 0 : index
    %6 = vector.load %arg4[%c0_4, %c0_5] : memref<1x512xf32, #tpu.memory_space<vmem>>, vector<1x512xf32>
    %7 = vector.broadcast %6 : vector<1x512xf32> to vector<16x512xf32>
    %8 = arith.addf %5, %7 : vector<16x512xf32>
    %c0_6 = arith.constant 0 : index
    %c0_7 = arith.constant 0 : index
    %9 = vector.load %arg6[%c0_6, %c0_7] : memref<16x1xf32, #tpu.memory_space<vmem>>, vector<16x1xf32>
    %cst_8 = arith.constant dense<0xFF800000> : vector<16xf32>
    %10 = vector.multi_reduction <maximumf>, %8, %cst_8 [1] : vector<16x512xf32> to vector<16xf32>
    %11 = vector.shape_cast %10 : vector<16xf32> to vector<16x1xf32>
    %12 = arith.maximumf %9, %11 : vector<16x1xf32>
    %c0_9 = arith.constant 0 : index
    %c0_10 = arith.constant 0 : index
    %13 = vector.load %arg7[%c0_9, %c0_10] : memref<16x1xf32, #tpu.memory_space<vmem>>, vector<16x1xf32>
    %14 = arith.subf %9, %12 : vector<16x1xf32>
    %15 = math.exp %14 : vector<16x1xf32>
    %16 = arith.mulf %13, %15 : vector<16x1xf32>
    %17 = vector.broadcast %12 : vector<16x1xf32> to vector<16x512xf32>
    %18 = arith.subf %8, %17 : vector<16x512xf32>
    %19 = math.exp %18 : vector<16x512xf32>
    %cst_11 = arith.constant dense<0.000000e+00> : vector<16xf32>
    %20 = vector.multi_reduction <add>, %19, %cst_11 [1] : vector<16x512xf32> to vector<16xf32>
    %21 = vector.shape_cast %20 : vector<16xf32> to vector<16x1xf32>
    %22 = arith.addf %16, %21 : vector<16x1xf32>
    %c0_12 = arith.constant 0 : index
    %c0_13 = arith.constant 0 : index
    %23 = vector.load %arg7[%c0_12, %c0_13] : memref<16x1xf32, #tpu.memory_space<vmem>>, vector<16x1xf32>
    tpu.vector_store %arg7[%c0_12, %c0_13], %22 {strides = array<i32>} : memref<16x1xf32, #tpu.memory_space<vmem>>, vector<16x1xf32>,
    %c0_14 = arith.constant 0 : index
    %c0_15 = arith.constant 0 : index
    %24 = vector.load %arg6[%c0_14, %c0_15] : memref<16x1xf32, #tpu.memory_space<vmem>>, vector<16x1xf32>
    tpu.vector_store %arg6[%c0_14, %c0_15], %12 {strides = array<i32>} : memref<16x1xf32, #tpu.memory_space<vmem>>, vector<16x1xf32>,
    %c512_i32 = arith.constant 512 : i32
    %25 = arith.muli %arg1, %c512_i32 : i32
    %26 = tpu.assume_multiple %25, 512 : i32
    %c0_16 = arith.constant 0 : index
    %27 = arith.index_cast %26 : i32 to index
    %28 = vector.load %arg5[%c0_16, %27] : memref<16x512xf32, #tpu.memory_space<vmem>>, vector<16x512xf32>
    tpu.vector_store %arg5[%c0_16, %27], %8 {strides = array<i32>} : memref<16x512xf32, #tpu.memory_space<vmem>>, vector<16x512xf32>,
    %c0_i32_17 = arith.constant 0 : i32
    %29 = arith.cmpi eq, %arg1, %c0_i32_17 : i32
    %30 = arith.extui %29 : i1 to i32
    %c0_i32_18 = arith.constant 0 : i32
    %31 = arith.cmpi ne, %30, %c0_i32_18 : i32
    scf.if %31 {
      %c0_19 = arith.constant 0 : index
      %c0_20 = arith.constant 0 : index
      %32 = vector.load %arg6[%c0_19, %c0_20] : memref<16x1xf32, #tpu.memory_space<vmem>>, vector<16x1xf32>
      %c0_21 = arith.constant 0 : index
      %c0_22 = arith.constant 0 : index
      %33 = vector.load %arg7[%c0_21, %c0_22] : memref<16x1xf32, #tpu.memory_space<vmem>>, vector<16x1xf32>
      %34 = math.log %33 : vector<16x1xf32>
      %35 = arith.addf %32, %34 : vector<16x1xf32>
      %c0_23 = arith.constant 0 : index
      %c0_24 = arith.constant 0 : index
      %36 = vector.load %arg5[%c0_23, %c0_24] : memref<16x512xf32, #tpu.memory_space<vmem>>, vector<16x512xf32>
      %37 = vector.broadcast %35 : vector<16x1xf32> to vector<16x512xf32>
      %38 = arith.subf %36, %37 : vector<16x512xf32>
      %c0_25 = arith.constant 0 : index
      %c0_26 = arith.constant 0 : index
      %39 = vector.load %arg5[%c0_25, %c0_26] : memref<16x512xf32, #tpu.memory_space<vmem>>, vector<16x512xf32>
      tpu.vector_store %arg5[%c0_25, %c0_26], %38 {strides = array<i32>} : memref<16x512xf32, #tpu.memory_space<vmem>>, vector<16x512xf32>,
    } else {
    }
    return
  }
  func.func @transform_0(%arg0: i32, %arg1: i32) -> (i32, i32) {
    %c0_i32 = arith.constant 0 : i32
    %c0_i32_0 = arith.constant 0 : i32
    return %arg0, %c0_i32 : i32, i32
  }
  func.func @transform_1(%arg0: i32, %arg1: i32) -> (i32, i32) {
    %c0_i32 = arith.constant 0 : i32
    %c0_i32_0 = arith.constant 0 : i32
    return %c0_i32, %arg1 : i32, i32
  }
  func.func @transform_2(%arg0: i32, %arg1: i32) -> (i32, i32) {
    %c0_i32 = arith.constant 0 : i32
    %c0_i32_0 = arith.constant 0 : i32
    return %c0_i32, %arg1 : i32, i32
  }
  func.func @transform_3(%arg0: i32, %arg1: i32) -> (i32, i32) {
    %c0_i32 = arith.constant 0 : i32
    %c0_i32_0 = arith.constant 0 : i32
    return %arg0, %c0_i32 : i32, i32
  }
}

</mosaic_0001>

<bundles_post_ra>
// kernel: generator_forward.1
= control target key start
LH: loop header
LB: loop body
LE: loop exit
PB: predicated region body
PF: predicated region fallthrough
CT: control target
= control target key end

     0   :  { %8 = vsyncpa [#allocation5], 0  ;;  %s574_s0 = inlined_call_operand.vmem [shape: bf16[16,32], index: 0, kind: input, shape index: {}]   ;;  %s575_s1 = inlined_call_operand.hbm [shape: bf16[32,512], index: 1, kind: input, shape index: {}]   ;;  %s576_s2 = inlined_call_operand.vmem [shape: f32[1,512], index: 2, kind: input, shape index: {}]   ;;  %s577_s3 = inlined_call_operand.hbm [shape: f32[16,512], index: 3, kind: output, shape index: {}]  }
   0x1   :  { %9 = vsyncpa [#allocation6], 0  ;;  %s467_s12 = smov [#allocation4]   ;;  %s419_s16 = scalar_lea.hbm %s575_s1, 1024 }
   0x2   :  { %s17_s13 = sshll.u32 %s467_s12, 4  ;;  %p420_p0 = scmp.ne.s32.totalorder %s575_s1, %s419_s16  ;;  %s18_s13 = int_to_ptr.vmem [resolvable:$true] %s17_s13 }
   0x3   :  { %p423_p1 = scmp.lt.u32.totalorder %s419_s16, %s575_s1 }
   0x5   :  { %p425_p2 = pnand %p423_p1, %p420_p0 }
   0x7   :  { %428 = shalt.err (!%p425_p2)
}
   0x8   :  { %s429_s21 = scalar_lea.vmem %s18_s13, 1024  ;;  %p434_p4 = scmp.lt.s32.totalorder %s18_s13, %s18_s13 }
   0x9   :  { %p430_p3 = scmp.ne.s32.totalorder %s18_s13, %s429_s21  ;;  %p435_p5 = scmp.lt.s32.totalorder %s429_s21, %s429_s21 }
   0xb   :  { %p436_p6 = por %p435_p5, %p434_p4 }
   0xd   :  { %p437_p7 = pnand %p436_p6, %p430_p3 }
   0xf   :  { %440 = shalt.err (!%p437_p7)
}
  0x10   :  { %s468_s22 = smov 256   ;;  %s469_s23 = smov 16  }
  0x11   :  { %23 = dma.hbm_to_vmem [thread:$0]  %s575_s1, 1024, %s18_s13, [#allocation5], %s468_s22, %s468_s22, %s469_s23  }
  0x12   :  { %463 = dma.done.wait [#allocation5], 1024  }
  0x13   :  { %464 = vsyncadd [#allocation5], 4294966272  ;;  %v470_v0 = vmov 0   ;;  %v382_v1 = vld [vmem:[#allocation4 + $0x4] ss:$16 sps:$4 sm:$0xff]   ;;  %vm116_vm0 = vcmask 261120   ;;  %v51_v11 = vlaneseq }
  0x14   :  { %152 = vmatprep.mubr.bf16.mxu0 %v470_v0  ;;  %195 = vmatprep.mubr.bf16.mxu1 %v470_v0  ;;  %v384_v2 = vld [vmem:[#allocation4 + $0xc] ss:$16 sps:$4 sm:$0xff]   ;;  %v386_v3 = vld [vmem:[#allocation4] ss:$16 sps:$4 sm:$0xff]   ;;  %v387_v4 = vld [vmem:[#allocation4 + $0x8] ss:$16 sps:$4 sm:$0xff]  }
  0x15   :  { %380 = vset.pattern.permute.xlu1 %v470_v0  ;;  %381 = vset.pattern.permute.xlu0 %v470_v0  ;;  %v388_v5 = vld [vmem:[#allocation4 + $0x24] ss:$16 sps:$4 sm:$0xff]   ;;  %v390_v6 = vld [vmem:[#allocation4 + $0x2c] ss:$16 sps:$4 sm:$0xff]   ;;  %v392_v7 = vld [vmem:[#allocation4 + $0x20] ss:$16 sps:$4 sm:$0xff]  }
  0x16   :  { %120 = vmatprep.subr.bf16.mxu0 %v382_v1  ;;  %163 = vmatprep.subr.bf16.mxu1 %v384_v2  ;;  %v393_v8 = vld [vmem:[#allocation4 + $0x28] ss:$16 sps:$4 sm:$0xff]   ;;  %v394_v9 = vld [vmem:[%s574_s0] sm:$0xff]   ;;  %vm34_vm1 = vcmask 7168   ;;  %v471_v10 = vmov -inf   ;;  %v52_v12 = vshrl.u32 %v51_v11, 7 }
  0x17   :  { %121 = vmatpush1.bf16.msra.mxu0 %v386_v3  ;;  %164 = vmatpush1.bf16.msra.mxu1 %v387_v4  ;;  %35 = vst.msk [vmem:[#allocation2] sm:$0xff] %vm34_vm1, %v471_v10  ;;  %36 = vst.msk [vmem:[#allocation2 + $0x8] sm:$0xff] %vm34_vm1, %v471_v10  ;;  %v49_v15 = vld [vmem:[%s576_s2] sm:$0xf]  ;;  %v472_v44 = vmov 0.0   ;;  %s473_s0 = smov [#allocation7]  }
  0x18   :  { %122 = vmatprep.subr.bf16.mxu0 %v388_v5  ;;  %165 = vmatprep.subr.bf16.mxu1 %v390_v6  ;;  %v53_v13 = vsub.s32 0, %v52_v12  ;;  %v61_v14 = vsub.s32 2, %v52_v12  ;;  %v57_v16 = vsub.s32 1, %v52_v12  ;;  %v65_v17 = vsub.s32 3, %v52_v12  ;;  %37 = vst.msk [vmem:[#allocation3] sm:$0xff] %vm34_vm1, %v472_v44  ;;  %38 = vst.msk [vmem:[#allocation3 + $0x8] sm:$0xff] %vm34_vm1, %v472_v44 }
  0x19   :  { %s346_s2 = sshll.u32 %s473_s0, 4  ;;  %s347_s2 = int_to_ptr.vmem [resolvable:$true] %s346_s2 }
  0x1a   :  { %v54_v18 = vrot.slane %v49_v15, %v53_v13  ;;  %v62_v19 = vrot.slane %v49_v15, %v61_v14  ;;  %v58_v20 = vrot.slane %v49_v15, %v57_v16  ;;  %v66_v21 = vrot.slane %v49_v15, %v65_v17  ;;  %s441_s29 = scalar_lea.vmem %s347_s2, 1024  ;;  %p446_p9 = scmp.lt.s32.totalorder %s347_s2, %s347_s2 }
  0x1b   :  { %123 = vmatpush1.bf16.msra.mxu0 %v392_v7  ;;  %166 = vmatpush1.bf16.msra.mxu1 %v393_v8  ;;  %p442_p8 = scmp.ne.s32.totalorder %s347_s2, %s441_s29  ;;  %p447_p10 = scmp.lt.s32.totalorder %s441_s29, %s441_s29 }
  0x1d   :  { %p448_p11 = por %p447_p10, %p446_p9 }
  0x1e   :  { %369 = vmatmul.mubr.msk.bf16.vlgmr.msra.gmra.mrb[0].mxu0 %vm116_vm0, %v394_v9  ;;  %370 = vmatmul.mubr.msk.bf16.vlgmr.msra.gmra.mrb[0].mxu1 %vm116_vm0, %v394_v9  ;;  %v206_v45 = vld [vmem:[#allocation2] sm:$0xff]  ;;  %v207_v48 = vld [vmem:[#allocation2 + $0x8] sm:$0xff] }
  0x1f   :  { %p449_p12 = pnand %p448_p11, %p442_p8 }
  0xf1   :  { %v154_v22 = vpop.f32.mrb[0].mxu0  ;;  %v197_v23 = vpop.f32.mrb[0].mxu1 }
  0xf2   :  { %v516_v24 = vadd.f32 %v154_v22, %v54_v18  ;;  %v518_v25 = vadd.f32 %v197_v23, %v62_v19  ;;  %v156_v26 = vpop.f32.mrb[1].mxu0  ;;  %v199_v27 = vpop.f32.mrb[1].mxu1 }
  0xf3   :  { %v520_v28 = vadd.f32 %v156_v26, %v58_v20  ;;  %v522_v29 = vadd.f32 %v199_v27, %v66_v21  ;;  %v158_v30 = vpop.f32.mrb[2].mxu0  ;;  %v201_v31 = vpop.f32.mrb[2].mxu1  ;;  %v220_v26 = vld [vmem:[#allocation3] sm:$0xff] }
  0xf4   :  { %v524_v32 = vadd.f32 %v158_v30, %v54_v18  ;;  %v526_v33 = vadd.f32 %v201_v31, %v62_v19  ;;  %v160_v34 = vpop.f32.mrb[3].mxu0  ;;  %v203_v35 = vpop.f32.mrb[3].mxu1  ;;  %v208_v36 = vmax.f32 %v516_v24, %v518_v25 }
  0xf5   :  { %v530_v37 = vadd.f32 %v160_v34, %v58_v20  ;;  %v532_v38 = vadd.f32 %v203_v35, %v66_v21  ;;  %v209_v39 = vmax.f32 %v520_v28, %v522_v29  ;;  %v221_v34 = vld [vmem:[#allocation3 + $0x8] sm:$0xff] }
  0xf6   :  { %v213_v41 = vmax.f32 %v524_v32, %v526_v33 }
  0xf7   :  { %v210_v40 = vmax.f32 %v208_v36, %v209_v39  ;;  %v214_v42 = vmax.f32 %v530_v37, %v532_v38 }
  0xf9   :  { %211 = vmax.xlane.f32.xlu0 %v210_v40  ;;  %v215_v43 = vmax.f32 %v213_v41, %v214_v42 }
  0xfd   :  { %216 = vmax.xlane.f32.xlu0 %v215_v43 }
 0x186   :  { %v212_v46 = vpop.xlane.xlu0 %211 }
 0x187   :  { %v218_v47 = vmax.f32 %v206_v45, %v212_v46 }
 0x189   :  { %v222_v49 = vsub.f32 %v206_v45, %v218_v47  ;;  %279 = vst.msk [vmem:[#allocation2] sm:$0xff] %vm34_vm1, %v218_v47  ;;  %232 = vperm.xlu1 %380, %v218_v47  }
 0x18a   :  { %v217_v50 = vpop.xlane.xlu0 %216 }
 0x18b   :  { %v219_v51 = vmax.f32 %v207_v48, %v217_v50  ;;  %v224_v21 = vmul.f32 1.442695, %v222_v49 }
 0x18d   :  { %v223_v52 = vsub.f32 %v207_v48, %v219_v51  ;;  %280 = vst.msk [vmem:[#allocation2 + $0x8] sm:$0xff] %vm34_vm1, %v219_v51  ;;  %237 = vperm.xlu1 %380, %v219_v51  }
 0x18f   :  { %v226_v22 = vmul.f32 1.442695, %v223_v52 }
 0x190   :  { %v297_v45 = vld [vmem:[#allocation2] sm:$0xff] }
 0x194   :  { %v298_v49 = vld [vmem:[#allocation2 + $0x8] sm:$0xff] }
 0x208   :  { %v233_v53 = vpop.permute.xlu1 %232 }
 0x209   :  { %v240_v54 = vsub.f32 %v516_v24, %v233_v53  ;;  %v241_v55 = vsub.f32 %v520_v28, %v233_v53  ;;  %v242_v56 = vsub.f32 %v518_v25, %v233_v53  ;;  %v243_v57 = vsub.f32 %v522_v29, %v233_v53 }
 0x20b   :  { %v248_v58 = vmul.f32 1.442695, %v240_v54  ;;  %v250_v59 = vmul.f32 1.442695, %v241_v55  ;;  %v252_v60 = vmul.f32 1.442695, %v242_v56 }
 0x20c   :  { %v254_v61 = vmul.f32 1.442695, %v243_v57  ;;  %v238_v62 = vpop.permute.xlu1 %237 }
 0x20d   :  { %395 = vpow2.f32 %v248_v58  ;;  %v244_v63 = vsub.f32 %v524_v32, %v238_v62  ;;  %v245_v0 = vsub.f32 %v530_v37, %v238_v62  ;;  %v246_v1 = vsub.f32 %v526_v33, %v238_v62 }
 0x20e   :  { %397 = vpow2.f32 %v250_v59  ;;  %v247_v2 = vsub.f32 %v532_v38, %v238_v62 }
 0x20f   :  { %399 = vpow2.f32 %v252_v60  ;;  %v256_v3 = vmul.f32 1.442695, %v244_v63  ;;  %v258_v4 = vmul.f32 1.442695, %v245_v0  ;;  %v260_v5 = vmul.f32 1.442695, %v246_v1 }
 0x210   :  { %401 = vpow2.f32 %v254_v61  ;;  %v262_v6 = vmul.f32 1.442695, %v247_v2 }
 0x211   :  { %403 = vpow2.f32 %v256_v3 }
 0x212   :  { %405 = vpow2.f32 %v258_v4 }
 0x213   :  { %407 = vpow2.f32 %v260_v5 }
 0x214   :  { %409 = vpow2.f32 %v262_v6 }
 0x215   :  { %411 = vpow2.f32 %v224_v21 }
 0x216   :  { %413 = vpow2.f32 %v226_v22 }
 0x217   :  { %v396_v7 = vpop.eup %395 }
 0x218   :  { %v398_v8 = vpop.eup %397 }
 0x219   :  { %v400_v9 = vpop.eup %399  ;;  %v264_v10 = vadd.f32 %v398_v8, %v396_v7 }
 0x21a   :  { %v402_v11 = vpop.eup %401 }
 0x21b   :  { %v404_v12 = vpop.eup %403  ;;  %v265_v13 = vadd.f32 %v400_v9, %v264_v10 }
 0x21c   :  { %v406_v14 = vpop.eup %405 }
 0x21d   :  { %v266_v15 = vadd.f32 %v402_v11, %v265_v13  ;;  %v269_v16 = vadd.f32 %v406_v14, %v404_v12  ;;  %v408_v17 = vpop.eup %407 }
 0x21e   :  { %v410_v19 = vpop.eup %409 }
 0x21f   :  { %267 = vadd.xlane.f32.xlu0 %v266_v15  ;;  %v270_v18 = vadd.f32 %v408_v17, %v269_v16  ;;  %v412_v23 = vpop.eup %411 }
 0x220   :  { %v228_v27 = vmul.f32 %v412_v23, %v220_v26  ;;  %v414_v30 = vpop.eup %413 }
 0x221   :  { %v271_v20 = vadd.f32 %v410_v19, %v270_v18  ;;  %v229_v36 = vmul.f32 %v414_v30, %v221_v34 }
 0x223   :  { %272 = vadd.xlane.f32.xlu1 %v271_v20 }
 0x2ac   :  { %v268_v31 = vpop.xlane.xlu0 %267 }
 0x2ad   :  { %v274_v35 = vadd.f32 %v268_v31, %v228_v27 }
 0x2af   :  { %277 = vst.msk [vmem:[#allocation3] sm:$0xff] %vm34_vm1, %v274_v35 }
 0x2b0   :  { %v273_v39 = vpop.xlane.xlu1 %272 }
 0x2b1   :  { %v275_v40 = vadd.f32 %v273_v39, %v229_v36 }
 0x2b3   :  { %278 = vst.msk [vmem:[#allocation3 + $0x8] sm:$0xff] %vm34_vm1, %v275_v40 }
 0x2b6   :  { %v299_v41 = vld [vmem:[#allocation3] sm:$0xff] }
 0x2b7   :  { %415 = vlog2.f32 %v299_v41 }
 0x2ba   :  { %v300_v42 = vld [vmem:[#allocation3 + $0x8] sm:$0xff] }
 0x2bb   :  { %417 = vlog2.f32 %v300_v42 }
 0x2c1   :  { %v416_v43 = vpop.eup %415 }
 0x2c2   :  { %v302_v44 = vmul.f32 0.6931472, %v416_v43 }
 0x2c4   :  { %v305_v46 = vadd.f32 %v302_v44, %v297_v45 }
 0x2c5   :  { %v418_v47 = vpop.eup %417 }
 0x2c6   :  { %317 = vperm.xlu0 %381, %v305_v46   ;;  %v304_v48 = vmul.f32 0.6931472, %v418_v47 }
 0x2c8   :  { %v306_v50 = vadd.f32 %v304_v48, %v298_v49 }
 0x2ca   :  { %322 = vperm.xlu1 %380, %v306_v50  }
 0x345   :  { %v318_v51 = vpop.permute.xlu0 %317 }
 0x346   :  { %v325_v52 = vsub.f32 %v516_v24, %v318_v51  ;;  %v326_v53 = vsub.f32 %v520_v28, %v318_v51  ;;  %v327_v54 = vsub.f32 %v518_v25, %v318_v51  ;;  %v328_v55 = vsub.f32 %v522_v29, %v318_v51 }
 0x348   :  { %333 = vst [vmem:[#allocation7] sm:$0xff] %v325_v52  ;;  %334 = vst [vmem:[#allocation7 + $0x8] sm:$0xff] %v326_v53 }
 0x349   :  { %335 = vst [vmem:[#allocation7 + $0x10] sm:$0xff] %v327_v54  ;;  %336 = vst [vmem:[#allocation7 + $0x18] sm:$0xff] %v328_v55  ;;  %v323_v56 = vpop.permute.xlu1 %322 }
 0x34a   :  { %v329_v57 = vsub.f32 %v524_v32, %v323_v56  ;;  %v330_v58 = vsub.f32 %v530_v37, %v323_v56  ;;  %v331_v59 = vsub.f32 %v526_v33, %v323_v56  ;;  %v332_v24 = vsub.f32 %v532_v38, %v323_v56 }
 0x34c   :  { %337 = vst [vmem:[#allocation7 + $0x20] sm:$0xff] %v329_v57  ;;  %338 = vst [vmem:[#allocation7 + $0x28] sm:$0xff] %v330_v58 }
 0x34d   :  { %339 = vst [vmem:[#allocation7 + $0x30] sm:$0xff] %v331_v59  ;;  %340 = vst [vmem:[#allocation7 + $0x38] sm:$0xff] %v332_v24 }
 0x34e   :  { %452 = shalt.err (!%p449_p12)
}
 0x34f   :  { %s453_s5 = scalar_lea.hbm %s577_s3, 1024 }
 0x350   :  { %p454_p13 = scmp.ne.s32.totalorder %s577_s3, %s453_s5  ;;  %p457_p0 = scmp.lt.u32.totalorder %s453_s5, %s577_s3 }
 0x352   :  { %p459_p1 = pnand %p457_p0, %p454_p13 }
 0x354   :  { %462 = shalt.err (!%p459_p1)
}
 0x355   :  { %s474_s10 = smov 512   ;;  %s475_s11 = smov 32  }
 0x356   :  { %352 = dma.vmem_to_hbm [thread:$0]  %s347_s2, 1024, %s577_s3, [#allocation6], %s474_s10, %s474_s10, %s475_s11  }
 0x357   :  { %465 = dma.done.wait [#allocation6], 1024  }
 0x358   :  { %466 = vsyncadd [#allocation6], 4294966272 }
 0x359   :  { %356 = vsyncpa [#allocation5], 1 }
 0x35a   :  { %357 = vsyncpa [#allocation6], 1 }

</bundles_post_ra>
